<compile_context>
chip_gen: v7x
topology: tpu7x:2x2x1
jax: 0.10.0
libtpu: 0.0.40
codegen_flags: <defaults>
</compile_context>

<pallas_src>
import functools

import jax
import jax.numpy as jnp
from jax.experimental import pallas as pl
from jax.experimental.pallas import tpu as pltpu


def _round_up(n, m):
    return (n + m - 1) // m * m


# ---------------------------------------------------------------------------
# Kernel
# ---------------------------------------------------------------------------
def relational_kernel(x_ref,
                      w0_ref, b0_ref,
                      w1_ref, b1_ref,
                      w2_ref, b2_ref,
                      w3_ref, b3_ref,
                      o_ref,
                      *, bf16_epilogue):
    """One row-tile of the 4x (Linear -> ReLU) MLP.

    bf16 MXU matmuls with f32 accumulation.  Bias-add / ReLU epilogue runs in
    bf16 (v6e/v7x, bf16 VALU) or f32 (v5e and older).
    """
    h = x_ref[...]                              # f32 [tm, input_size]
    for w_ref, b_ref in ((w0_ref, b0_ref), (w1_ref, b1_ref),
                         (w2_ref, b2_ref), (w3_ref, b3_ref)):
        acc = jnp.dot(h.astype(jnp.bfloat16), w_ref[...],
                      preferred_element_type=jnp.float32)
        if bf16_epilogue:
            h = jnp.maximum(acc.astype(jnp.bfloat16) + b_ref[...], 0.0)
        else:
            h = jnp.maximum(acc + b_ref[...], 0.0)
    o_ref[...] = h.astype(o_ref.dtype)          # f32, natural output width


# ---------------------------------------------------------------------------
# Wrapper helpers
# ---------------------------------------------------------------------------
def _has_bf16_valu():
    """bf16 VPU exists on v6e/v7x; v5e and older would just unpack to f32."""
    try:
        kind = jax.devices()[0].device_kind.lower()
    except Exception:
        return True
    return not any(tag in kind for tag in ("v2", "v3", "v4", "v5"))


def _vmem_limit_bytes(fraction=0.7):
    """Generation-aware VMEM limit (leave headroom for Mosaic scratch)."""
    try:
        cap = pltpu.get_tpu_info().vmem_capacity_bytes
        return int(cap * fraction)
    except Exception:
        return None  # fall back to compiler default


def _row_tiling(M, *, max_tile=512, min_tiles=2):
    """Balanced row tiles; >= 2 tiles so both v7x TensorCores get work."""
    n_tiles = max(min_tiles, pl.cdiv(M, max_tile))
    tm = min(_round_up(pl.cdiv(M, n_tiles), 8), _round_up(M, 8))
    grid = (pl.cdiv(M, tm),)
    return tm, grid


def prepare_params(params, *, bf16_epilogue=None):
    """One-time cast of weights to bf16 (MXU) and biases to the epilogue dtype.

    Hoist this out of the per-step path: the result can be reused across calls.
    """
    if bf16_epilogue is None:
        bf16_epilogue = _has_bf16_valu()
    bias_dtype = jnp.bfloat16 if bf16_epilogue else jnp.float32
    prepared = {}
    for n in range(4):
        prepared[f"w{n}"] = params[f"w{n}"].astype(jnp.bfloat16)
        prepared[f"b{n}"] = params[f"b{n}"].reshape(1, -1).astype(bias_dtype)
    return prepared


# ---------------------------------------------------------------------------
# Forward pass
# ---------------------------------------------------------------------------
def relational_model(x, prepared, *, max_tile=512):
    """
    Args:
      x:        [batch, n_relations, input_size] float32
      prepared: output of prepare_params (bf16 weights [in, out], biases [1, out])
    Returns:
      [batch, n_relations, output_size] float32
    """
    batch, n_rel, input_size = x.shape
    output_size = prepared["w3"].shape[1]

    M = batch * n_rel
    x2d = x.reshape(M, input_size)              # reshape only; no pad, no cast

    tm, grid = _row_tiling(M, max_tile=max_tile)
    bf16_epilogue = prepared["b0"].dtype == jnp.bfloat16
    kernel = functools.partial(relational_kernel, bf16_epilogue=bf16_epilogue)
    vmem_limit = _vmem_limit_bytes()

    # TODO(synk): if total resident weight bytes exceed ~40 MiB (large hidden
    # sizes on v7x's 64 MiB VMEM), tile w1/w2 over a hidden-dim grid axis
    # instead of full-array residency.

    def build_and_run(single_buffer_weights):
        def resident(shape):
            # Constant index_map -> weights/biases stay resident in VMEM; with
            # single buffering their footprint is not doubled.
            if single_buffer_weights:
                return pl.BlockSpec(shape, lambda i: (0, 0),
                                    pipeline_mode=pl.Buffered(1))
            return pl.BlockSpec(shape, lambda i: (0, 0))

        in_specs = [pl.BlockSpec((tm, input_size), lambda i: (i, 0))]
        operands = [x2d]
        for n in range(4):
            w = prepared[f"w{n}"]
            b = prepared[f"b{n}"]
            in_specs += [resident(w.shape), resident(b.shape)]
            operands += [w, b]

        return pl.pallas_call(
            kernel,
            out_shape=jax.ShapeDtypeStruct((M, output_size), jnp.float32),
            grid=grid,
            in_specs=in_specs,
            out_specs=pl.BlockSpec((tm, output_size), lambda i: (i, 0)),
            compiler_params=pltpu.CompilerParams(
                dimension_semantics=("parallel",),
                vmem_limit_bytes=vmem_limit),
        )(*operands)

    try:
        out2d = build_and_run(True)
    except Exception:
        # pipeline_mode=pl.Buffered(1) not supported on this jax version /
        # backend: fall back to default (double-buffered) resident specs.
        out2d = build_and_run(False)

    return out2d.reshape(batch, n_rel, output_size)


# ---------------------------------------------------------------------------
# Parameters + reference
# ---------------------------------------------------------------------------
def init_params(key, input_size, hidden_size, output_size):
    """Deterministic synthetic parameters (Linear weights stored as [in, out])."""
    keys = jax.random.split(key, 8)
    dims = [(input_size, hidden_size),
            (hidden_size, hidden_size),
            (hidden_size, hidden_size),
            (hidden_size, output_size)]
    params = {}
    for n, (din, dout) in enumerate(dims):
        scale = 1.0 / jnp.sqrt(din)
        params[f"w{n}"] = (jax.random.uniform(keys[2 * n], (din, dout),
                                              jnp.float32, -1.0, 1.0) * scale)
        params[f"b{n}"] = (jax.random.uniform(keys[2 * n + 1], (1, dout),
                                              jnp.float32, -1.0, 1.0) * scale)
    return params


def reference(x, params):
    """Pure-JAX f32 reference of the same forward pass (ReLU after every layer)."""
    b, r, f = x.shape
    h = x.reshape(-1, f)
    for n in range(4):
        h = jnp.maximum(h @ params[f"w{n}"] + params[f"b{n}"], 0.0)
    return h.reshape(b, r, -1)


if __name__ == "__main__":
    batch, n_relations = 2, 8
    input_size, hidden_size, output_size = 6, 32, 16

    key = jax.random.PRNGKey(0)
    kx, kp = jax.random.split(key)
    x = jax.random.normal(kx, (batch, n_relations, input_size), jnp.float32)
    params = init_params(kp, input_size, hidden_size, output_size)

    # Hoisted one-time weight/bias cast (reusable across forward calls).
    prepared = prepare_params(params)

    out = relational_model(x, prepared)
    out = jax.block_until_ready(out)

    ref = reference(x, params)
    assert out.shape == (batch, n_relations, output_size)
    # bf16 matmul inputs (and bf16 epilogue on v6e/v7x) with f32 accumulation:
    # allow ~1e-2-level deviation.
    assert jnp.allclose(out, ref, atol=5e-2, rtol=5e-2), "mismatch vs reference"

    print("KERNEL_OK")
</pallas_src>

<mosaic_0001>
module attributes {stable_mosaic.version = 11 : i64} {
  func.func @relational_kernel(%arg0: i32, %arg1: memref<8x6xf32, #tpu.memory_space<vmem>>, %arg2: memref<6x32xbf16, #tpu.memory_space<vmem>>, %arg3: memref<1x32xbf16, #tpu.memory_space<vmem>>, %arg4: memref<32x32xbf16, #tpu.memory_space<vmem>>, %arg5: memref<1x32xbf16, #tpu.memory_space<vmem>>, %arg6: memref<32x32xbf16, #tpu.memory_space<vmem>>, %arg7: memref<1x32xbf16, #tpu.memory_space<vmem>>, %arg8: memref<32x16xbf16, #tpu.memory_space<vmem>>, %arg9: memref<1x16xbf16, #tpu.memory_space<vmem>>, %arg10: memref<8x16xf32, #tpu.memory_space<vmem>>) attributes {dimension_semantics = [#tpu.dimension_semantics<parallel>], iteration_bounds = array<i64: 2>, scalar_prefetch = 0 : i64, scratch_operands = 0 : i64, tpu.core_type = #tpu.core_type<tc>, window_params = [{transform_indices = @transform_0, window_bounds = array<i64: 8, 6>}, {pipeline_mode = #tpu.pipeline_mode<synchronous>, transform_indices = @transform_1, window_bounds = array<i64: 6, 32>}, {pipeline_mode = #tpu.pipeline_mode<synchronous>, transform_indices = @transform_2, window_bounds = array<i64: 1, 32>}, {pipeline_mode = #tpu.pipeline_mode<synchronous>, transform_indices = @transform_3, window_bounds = array<i64: 32, 32>}, {pipeline_mode = #tpu.pipeline_mode<synchronous>, transform_indices = @transform_4, window_bounds = array<i64: 1, 32>}, {pipeline_mode = #tpu.pipeline_mode<synchronous>, transform_indices = @transform_5, window_bounds = array<i64: 32, 32>}, {pipeline_mode = #tpu.pipeline_mode<synchronous>, transform_indices = @transform_6, window_bounds = array<i64: 1, 32>}, {pipeline_mode = #tpu.pipeline_mode<synchronous>, transform_indices = @transform_7, window_bounds = array<i64: 32, 16>}, {pipeline_mode = #tpu.pipeline_mode<synchronous>, transform_indices = @transform_8, window_bounds = array<i64: 1, 16>}, {transform_indices = @transform_9, window_bounds = array<i64: 8, 16>}]} {
    %c0 = arith.constant 0 : index
    %c0_0 = arith.constant 0 : index
    %0 = vector.load %arg1[%c0, %c0_0] : memref<8x6xf32, #tpu.memory_space<vmem>>, vector<8x6xf32>
    %1 = arith.truncf %0 : vector<8x6xf32> to vector<8x6xbf16>
    %c0_1 = arith.constant 0 : index
    %c0_2 = arith.constant 0 : index
    %2 = vector.load %arg2[%c0_1, %c0_2] : memref<6x32xbf16, #tpu.memory_space<vmem>>, vector<6x32xbf16>
    %cst = arith.constant dense<0.000000e+00> : vector<8x32xf32>
    %3 = tpu.matmul %1, %2, %cst {dimension_numbers = #tpu.dot_dimension_numbers<[1], [0], [0], [1], [0, 0, 1, 1], [], []>} : vector<8x6xbf16>, vector<6x32xbf16>, vector<8x32xf32> -> vector<8x32xf32>
    %4 = arith.truncf %3 : vector<8x32xf32> to vector<8x32xbf16>
    %c0_3 = arith.constant 0 : index
    %c0_4 = arith.constant 0 : index
    %5 = vector.load %arg3[%c0_3, %c0_4] : memref<1x32xbf16, #tpu.memory_space<vmem>>, vector<1x32xbf16>
    %6 = vector.broadcast %5 : vector<1x32xbf16> to vector<8x32xbf16>
    %7 = arith.addf %4, %6 : vector<8x32xbf16>
    %cst_5 = arith.constant 0.000000e+00 : bf16
    %8 = vector.broadcast %cst_5 : bf16 to vector<8x32xbf16>
    %9 = arith.maximumf %7, %8 : vector<8x32xbf16>
    %c0_6 = arith.constant 0 : index
    %c0_7 = arith.constant 0 : index
    %10 = vector.load %arg4[%c0_6, %c0_7] : memref<32x32xbf16, #tpu.memory_space<vmem>>, vector<32x32xbf16>
    %cst_8 = arith.constant dense<0.000000e+00> : vector<8x32xf32>
    %11 = tpu.matmul %9, %10, %cst_8 {dimension_numbers = #tpu.dot_dimension_numbers<[1], [0], [0], [1], [0, 0, 1, 1], [], []>} : vector<8x32xbf16>, vector<32x32xbf16>, vector<8x32xf32> -> vector<8x32xf32>
    %12 = arith.truncf %11 : vector<8x32xf32> to vector<8x32xbf16>
    %c0_9 = arith.constant 0 : index
    %c0_10 = arith.constant 0 : index
    %13 = vector.load %arg5[%c0_9, %c0_10] : memref<1x32xbf16, #tpu.memory_space<vmem>>, vector<1x32xbf16>
    %14 = vector.broadcast %13 : vector<1x32xbf16> to vector<8x32xbf16>
    %15 = arith.addf %12, %14 : vector<8x32xbf16>
    %cst_11 = arith.constant 0.000000e+00 : bf16
    %16 = vector.broadcast %cst_11 : bf16 to vector<8x32xbf16>
    %17 = arith.maximumf %15, %16 : vector<8x32xbf16>
    %c0_12 = arith.constant 0 : index
    %c0_13 = arith.constant 0 : index
    %18 = vector.load %arg6[%c0_12, %c0_13] : memref<32x32xbf16, #tpu.memory_space<vmem>>, vector<32x32xbf16>
    %cst_14 = arith.constant dense<0.000000e+00> : vector<8x32xf32>
    %19 = tpu.matmul %17, %18, %cst_14 {dimension_numbers = #tpu.dot_dimension_numbers<[1], [0], [0], [1], [0, 0, 1, 1], [], []>} : vector<8x32xbf16>, vector<32x32xbf16>, vector<8x32xf32> -> vector<8x32xf32>
    %20 = arith.truncf %19 : vector<8x32xf32> to vector<8x32xbf16>
    %c0_15 = arith.constant 0 : index
    %c0_16 = arith.constant 0 : index
    %21 = vector.load %arg7[%c0_15, %c0_16] : memref<1x32xbf16, #tpu.memory_space<vmem>>, vector<1x32xbf16>
    %22 = vector.broadcast %21 : vector<1x32xbf16> to vector<8x32xbf16>
    %23 = arith.addf %20, %22 : vector<8x32xbf16>
    %cst_17 = arith.constant 0.000000e+00 : bf16
    %24 = vector.broadcast %cst_17 : bf16 to vector<8x32xbf16>
    %25 = arith.maximumf %23, %24 : vector<8x32xbf16>
    %c0_18 = arith.constant 0 : index
    %c0_19 = arith.constant 0 : index
    %26 = vector.load %arg8[%c0_18, %c0_19] : memref<32x16xbf16, #tpu.memory_space<vmem>>, vector<32x16xbf16>
    %cst_20 = arith.constant dense<0.000000e+00> : vector<8x16xf32>
    %27 = tpu.matmul %25, %26, %cst_20 {dimension_numbers = #tpu.dot_dimension_numbers<[1], [0], [0], [1], [0, 0, 1, 1], [], []>} : vector<8x32xbf16>, vector<32x16xbf16>, vector<8x16xf32> -> vector<8x16xf32>
    %28 = arith.truncf %27 : vector<8x16xf32> to vector<8x16xbf16>
    %c0_21 = arith.constant 0 : index
    %c0_22 = arith.constant 0 : index
    %29 = vector.load %arg9[%c0_21, %c0_22] : memref<1x16xbf16, #tpu.memory_space<vmem>>, vector<1x16xbf16>
    %30 = vector.broadcast %29 : vector<1x16xbf16> to vector<8x16xbf16>
    %31 = arith.addf %28, %30 : vector<8x16xbf16>
    %cst_23 = arith.constant 0.000000e+00 : bf16
    %32 = vector.broadcast %cst_23 : bf16 to vector<8x16xbf16>
    %33 = arith.maximumf %31, %32 : vector<8x16xbf16>
    %34 = arith.extf %33 : vector<8x16xbf16> to vector<8x16xf32>
    %c0_24 = arith.constant 0 : index
    %c0_25 = arith.constant 0 : index
    %35 = vector.load %arg10[%c0_24, %c0_25] : memref<8x16xf32, #tpu.memory_space<vmem>>, vector<8x16xf32>
    tpu.vector_store %arg10[%c0_24, %c0_25], %34 {strides = array<i32>} : memref<8x16xf32, #tpu.memory_space<vmem>>, vector<8x16xf32>,
    return
  }
  func.func @transform_0(%arg0: i32) -> (i32, i32) {
    %c0_i32 = arith.constant 0 : i32
    %c0_i32_0 = arith.constant 0 : i32
    return %arg0, %c0_i32 : i32, i32
  }
  func.func @transform_1(%arg0: i32) -> (i32, i32) {
    %c0_i32 = arith.constant 0 : i32
    %c0_i32_0 = arith.constant 0 : i32
    %c0_i32_1 = arith.constant 0 : i32
    return %c0_i32, %c0_i32_0 : i32, i32
  }
  func.func @transform_2(%arg0: i32) -> (i32, i32) {
    %c0_i32 = arith.constant 0 : i32
    %c0_i32_0 = arith.constant 0 : i32
    %c0_i32_1 = arith.constant 0 : i32
    return %c0_i32, %c0_i32_0 : i32, i32
  }
  func.func @transform_3(%arg0: i32) -> (i32, i32) {
    %c0_i32 = arith.constant 0 : i32
    %c0_i32_0 = arith.constant 0 : i32
    %c0_i32_1 = arith.constant 0 : i32
    return %c0_i32, %c0_i32_0 : i32, i32
  }
  func.func @transform_4(%arg0: i32) -> (i32, i32) {
    %c0_i32 = arith.constant 0 : i32
    %c0_i32_0 = arith.constant 0 : i32
    %c0_i32_1 = arith.constant 0 : i32
    return %c0_i32, %c0_i32_0 : i32, i32
  }
  func.func @transform_5(%arg0: i32) -> (i32, i32) {
    %c0_i32 = arith.constant 0 : i32
    %c0_i32_0 = arith.constant 0 : i32
    %c0_i32_1 = arith.constant 0 : i32
    return %c0_i32, %c0_i32_0 : i32, i32
  }
  func.func @transform_6(%arg0: i32) -> (i32, i32) {
    %c0_i32 = arith.constant 0 : i32
    %c0_i32_0 = arith.constant 0 : i32
    %c0_i32_1 = arith.constant 0 : i32
    return %c0_i32, %c0_i32_0 : i32, i32
  }
  func.func @transform_7(%arg0: i32) -> (i32, i32) {
    %c0_i32 = arith.constant 0 : i32
    %c0_i32_0 = arith.constant 0 : i32
    %c0_i32_1 = arith.constant 0 : i32
    return %c0_i32, %c0_i32_0 : i32, i32
  }
  func.func @transform_8(%arg0: i32) -> (i32, i32) {
    %c0_i32 = arith.constant 0 : i32
    %c0_i32_0 = arith.constant 0 : i32
    %c0_i32_1 = arith.constant 0 : i32
    return %c0_i32, %c0_i32_0 : i32, i32
  }
  func.func @transform_9(%arg0: i32) -> (i32, i32) {
    %c0_i32 = arith.constant 0 : i32
    %c0_i32_0 = arith.constant 0 : i32
    return %arg0, %c0_i32 : i32, i32
  }
}

module attributes {stable_mosaic.version = 11 : i64} {
  func.func @relational_kernel(%arg0: i32, %arg1: memref<8x6xf32, #tpu.memory_space<vmem>>, %arg2: memref<6x32xbf16, #tpu.memory_space<vmem>>, %arg3: memref<1x32xbf16, #tpu.memory_space<vmem>>, %arg4: memref<32x32xbf16, #tpu.memory_space<vmem>>, %arg5: memref<1x32xbf16, #tpu.memory_space<vmem>>, %arg6: memref<32x32xbf16, #tpu.memory_space<vmem>>, %arg7: memref<1x32xbf16, #tpu.memory_space<vmem>>, %arg8: memref<32x16xbf16, #tpu.memory_space<vmem>>, %arg9: memref<1x16xbf16, #tpu.memory_space<vmem>>, %arg10: memref<8x16xf32, #tpu.memory_space<vmem>>) attributes {dimension_semantics = [#tpu.dimension_semantics<parallel>], iteration_bounds = array<i64: 2>, scalar_prefetch = 0 : i64, scratch_operands = 0 : i64, tpu.core_type = #tpu.core_type<tc>, window_params = [{transform_indices = @transform_0, window_bounds = array<i64: 8, 6>}, {pipeline_mode = #tpu.pipeline_mode<synchronous>, transform_indices = @transform_1, window_bounds = array<i64: 6, 32>}, {pipeline_mode = #tpu.pipeline_mode<synchronous>, transform_indices = @transform_2, window_bounds = array<i64: 1, 32>}, {pipeline_mode = #tpu.pipeline_mode<synchronous>, transform_indices = @transform_3, window_bounds = array<i64: 32, 32>}, {pipeline_mode = #tpu.pipeline_mode<synchronous>, transform_indices = @transform_4, window_bounds = array<i64: 1, 32>}, {pipeline_mode = #tpu.pipeline_mode<synchronous>, transform_indices = @transform_5, window_bounds = array<i64: 32, 32>}, {pipeline_mode = #tpu.pipeline_mode<synchronous>, transform_indices = @transform_6, window_bounds = array<i64: 1, 32>}, {pipeline_mode = #tpu.pipeline_mode<synchronous>, transform_indices = @transform_7, window_bounds = array<i64: 32, 16>}, {pipeline_mode = #tpu.pipeline_mode<synchronous>, transform_indices = @transform_8, window_bounds = array<i64: 1, 16>}, {transform_indices = @transform_9, window_bounds = array<i64: 8, 16>}]} {
    %c0 = arith.constant 0 : index
    %c0_0 = arith.constant 0 : index
    %0 = vector.load %arg1[%c0, %c0_0] : memref<8x6xf32, #tpu.memory_space<vmem>>, vector<8x6xf32>
    %1 = arith.truncf %0 : vector<8x6xf32> to vector<8x6xbf16>
    %c0_1 = arith.constant 0 : index
    %c0_2 = arith.constant 0 : index
    %2 = vector.load %arg2[%c0_1, %c0_2] : memref<6x32xbf16, #tpu.memory_space<vmem>>, vector<6x32xbf16>
    %cst = arith.constant dense<0.000000e+00> : vector<8x32xf32>
    %3 = tpu.matmul %1, %2, %cst {dimension_numbers = #tpu.dot_dimension_numbers<[1], [0], [0], [1], [0, 0, 1, 1], [], []>} : vector<8x6xbf16>, vector<6x32xbf16>, vector<8x32xf32> -> vector<8x32xf32>
    %4 = arith.truncf %3 : vector<8x32xf32> to vector<8x32xbf16>
    %c0_3 = arith.constant 0 : index
    %c0_4 = arith.constant 0 : index
    %5 = vector.load %arg3[%c0_3, %c0_4] : memref<1x32xbf16, #tpu.memory_space<vmem>>, vector<1x32xbf16>
    %6 = vector.broadcast %5 : vector<1x32xbf16> to vector<8x32xbf16>
    %7 = arith.addf %4, %6 : vector<8x32xbf16>
    %cst_5 = arith.constant 0.000000e+00 : bf16
    %8 = vector.broadcast %cst_5 : bf16 to vector<8x32xbf16>
    %9 = arith.maximumf %7, %8 : vector<8x32xbf16>
    %c0_6 = arith.constant 0 : index
    %c0_7 = arith.constant 0 : index
    %10 = vector.load %arg4[%c0_6, %c0_7] : memref<32x32xbf16, #tpu.memory_space<vmem>>, vector<32x32xbf16>
    %cst_8 = arith.constant dense<0.000000e+00> : vector<8x32xf32>
    %11 = tpu.matmul %9, %10, %cst_8 {dimension_numbers = #tpu.dot_dimension_numbers<[1], [0], [0], [1], [0, 0, 1, 1], [], []>} : vector<8x32xbf16>, vector<32x32xbf16>, vector<8x32xf32> -> vector<8x32xf32>
    %12 = arith.truncf %11 : vector<8x32xf32> to vector<8x32xbf16>
    %c0_9 = arith.constant 0 : index
    %c0_10 = arith.constant 0 : index
    %13 = vector.load %arg5[%c0_9, %c0_10] : memref<1x32xbf16, #tpu.memory_space<vmem>>, vector<1x32xbf16>
    %14 = vector.broadcast %13 : vector<1x32xbf16> to vector<8x32xbf16>
    %15 = arith.addf %12, %14 : vector<8x32xbf16>
    %cst_11 = arith.constant 0.000000e+00 : bf16
    %16 = vector.broadcast %cst_11 : bf16 to vector<8x32xbf16>
    %17 = arith.maximumf %15, %16 : vector<8x32xbf16>
    %c0_12 = arith.constant 0 : index
    %c0_13 = arith.constant 0 : index
    %18 = vector.load %arg6[%c0_12, %c0_13] : memref<32x32xbf16, #tpu.memory_space<vmem>>, vector<32x32xbf16>
    %cst_14 = arith.constant dense<0.000000e+00> : vector<8x32xf32>
    %19 = tpu.matmul %17, %18, %cst_14 {dimension_numbers = #tpu.dot_dimension_numbers<[1], [0], [0], [1], [0, 0, 1, 1], [], []>} : vector<8x32xbf16>, vector<32x32xbf16>, vector<8x32xf32> -> vector<8x32xf32>
    %20 = arith.truncf %19 : vector<8x32xf32> to vector<8x32xbf16>
    %c0_15 = arith.constant 0 : index
    %c0_16 = arith.constant 0 : index
    %21 = vector.load %arg7[%c0_15, %c0_16] : memref<1x32xbf16, #tpu.memory_space<vmem>>, vector<1x32xbf16>
    %22 = vector.broadcast %21 : vector<1x32xbf16> to vector<8x32xbf16>
    %23 = arith.addf %20, %22 : vector<8x32xbf16>
    %cst_17 = arith.constant 0.000000e+00 : bf16
    %24 = vector.broadcast %cst_17 : bf16 to vector<8x32xbf16>
    %25 = arith.maximumf %23, %24 : vector<8x32xbf16>
    %c0_18 = arith.constant 0 : index
    %c0_19 = arith.constant 0 : index
    %26 = vector.load %arg8[%c0_18, %c0_19] : memref<32x16xbf16, #tpu.memory_space<vmem>>, vector<32x16xbf16>
    %cst_20 = arith.constant dense<0.000000e+00> : vector<8x16xf32>
    %27 = tpu.matmul %25, %26, %cst_20 {dimension_numbers = #tpu.dot_dimension_numbers<[1], [0], [0], [1], [0, 0, 1, 1], [], []>} : vector<8x32xbf16>, vector<32x16xbf16>, vector<8x16xf32> -> vector<8x16xf32>
    %28 = arith.truncf %27 : vector<8x16xf32> to vector<8x16xbf16>
    %c0_21 = arith.constant 0 : index
    %c0_22 = arith.constant 0 : index
    %29 = vector.load %arg9[%c0_21, %c0_22] : memref<1x16xbf16, #tpu.memory_space<vmem>>, vector<1x16xbf16>
    %30 = vector.broadcast %29 : vector<1x16xbf16> to vector<8x16xbf16>
    %31 = arith.addf %28, %30 : vector<8x16xbf16>
    %cst_23 = arith.constant 0.000000e+00 : bf16
    %32 = vector.broadcast %cst_23 : bf16 to vector<8x16xbf16>
    %33 = arith.maximumf %31, %32 : vector<8x16xbf16>
    %34 = arith.extf %33 : vector<8x16xbf16> to vector<8x16xf32>
    %c0_24 = arith.constant 0 : index
    %c0_25 = arith.constant 0 : index
    %35 = vector.load %arg10[%c0_24, %c0_25] : memref<8x16xf32, #tpu.memory_space<vmem>>, vector<8x16xf32>
    tpu.vector_store %arg10[%c0_24, %c0_25], %34 {strides = array<i32>} : memref<8x16xf32, #tpu.memory_space<vmem>>, vector<8x16xf32>,
    return
  }
  func.func @transform_0(%arg0: i32) -> (i32, i32) {
    %c0_i32 = arith.constant 0 : i32
    %c0_i32_0 = arith.constant 0 : i32
    return %arg0, %c0_i32 : i32, i32
  }
  func.func @transform_1(%arg0: i32) -> (i32, i32) {
    %c0_i32 = arith.constant 0 : i32
    %c0_i32_0 = arith.constant 0 : i32
    %c0_i32_1 = arith.constant 0 : i32
    return %c0_i32, %c0_i32_0 : i32, i32
  }
  func.func @transform_2(%arg0: i32) -> (i32, i32) {
    %c0_i32 = arith.constant 0 : i32
    %c0_i32_0 = arith.constant 0 : i32
    %c0_i32_1 = arith.constant 0 : i32
    return %c0_i32, %c0_i32_0 : i32, i32
  }
  func.func @transform_3(%arg0: i32) -> (i32, i32) {
    %c0_i32 = arith.constant 0 : i32
    %c0_i32_0 = arith.constant 0 : i32
    %c0_i32_1 = arith.constant 0 : i32
    return %c0_i32, %c0_i32_0 : i32, i32
  }
  func.func @transform_4(%arg0: i32) -> (i32, i32) {
    %c0_i32 = arith.constant 0 : i32
    %c0_i32_0 = arith.constant 0 : i32
    %c0_i32_1 = arith.constant 0 : i32
    return %c0_i32, %c0_i32_0 : i32, i32
  }
  func.func @transform_5(%arg0: i32) -> (i32, i32) {
    %c0_i32 = arith.constant 0 : i32
    %c0_i32_0 = arith.constant 0 : i32
    %c0_i32_1 = arith.constant 0 : i32
    return %c0_i32, %c0_i32_0 : i32, i32
  }
  func.func @transform_6(%arg0: i32) -> (i32, i32) {
    %c0_i32 = arith.constant 0 : i32
    %c0_i32_0 = arith.constant 0 : i32
    %c0_i32_1 = arith.constant 0 : i32
    return %c0_i32, %c0_i32_0 : i32, i32
  }
  func.func @transform_7(%arg0: i32) -> (i32, i32) {
    %c0_i32 = arith.constant 0 : i32
    %c0_i32_0 = arith.constant 0 : i32
    %c0_i32_1 = arith.constant 0 : i32
    return %c0_i32, %c0_i32_0 : i32, i32
  }
  func.func @transform_8(%arg0: i32) -> (i32, i32) {
    %c0_i32 = arith.constant 0 : i32
    %c0_i32_0 = arith.constant 0 : i32
    %c0_i32_1 = arith.constant 0 : i32
    return %c0_i32, %c0_i32_0 : i32, i32
  }
  func.func @transform_9(%arg0: i32) -> (i32, i32) {
    %c0_i32 = arith.constant 0 : i32
    %c0_i32_0 = arith.constant 0 : i32
    return %arg0, %c0_i32 : i32, i32
  }
}

</mosaic_0001>

<bundles_post_ra>
// kernel: tpu_custom_call.1
= control target key start
LH: loop header
LB: loop body
LE: loop exit
PB: predicated region body
PF: predicated region fallthrough
CT: control target
= control target key end

     0   :  { %14 = vsyncpa [#allocation3], 0  ;;  %s1045_s0 = inlined_call_operand.vmem [shape: f32[16,6], index: 0, kind: input, shape index: {}]   ;;  %s1046_s1 = inlined_call_operand.vmem [shape: bf16[6,32], index: 1, kind: input, shape index: {}]   ;;  %s1047_s2 = inlined_call_operand.vmem [shape: bf16[1,32], index: 2, kind: input, shape index: {}]   ;;  %s1048_s3 = inlined_call_operand.vmem [shape: bf16[32,32], index: 3, kind: input, shape index: {}]   ;;  %s1049_s4 = inlined_call_operand.vmem [shape: bf16[1,32], index: 4, kind: input, shape index: {}]   ;;  %s1050_s5 = inlined_call_operand.vmem [shape: bf16[32,32], index: 5, kind: input, shape index: {}]   ;;  %s1051_s6 = inlined_call_operand.vmem [shape: bf16[1,32], index: 6, kind: input, shape index: {}]   ;;  %s1052_s7 = inlined_call_operand.vmem [shape: bf16[32,16], index: 7, kind: input, shape index: {}]   ;;  %s1053_s8 = inlined_call_operand.vmem [shape: bf16[1,16], index: 8, kind: input, shape index: {}]   ;;  %s1054_s9 = inlined_call_operand.hbm [shape: f32[16,16], index: 9, kind: output, shape index: {}]  }
   0x1   :  { %16 = vsyncpa [#allocation3 + $0x1], 0  ;;  %s905_s30 = smov 0   ;;  %s907_s10 = smov 0  }
   0x2   :  { %s909_s11 = smov 0   ;;  %s911_s12 = smov 0  }
   0x3 LB: > { %s926_s13 = sadd.s32 4294967295, %s849_s12   ;;  %s678_s14 = sadd.s32 4294967294, %s849_s12   ;;  %s849_s12 = sphi %s911_s12, %s1060_s12   ;;  %s845_s11 = sphi %s909_s11, %s1059_s11   ;;  %s841_s10 = sphi %s907_s10, %s1058_s10   ;;  %s837_s30 = sphi %s905_s30, %s1057_s30  }
   0x4   : > { %s930_s15 = sadd.s32 1, %s849_s12   ;;  %s223_s16 = sadd.s32 1, %s845_s11 }
   0x5   : > { %s220_s17 = ssub.s32 %s849_s12, %s930_s15  ;;  %p233_p0 = scmp.ne.s32.totalorder %s845_s11, %s841_s10 }
   0x6   : > { %p221_p1 = scmp.eq.s32.totalorder %s220_s17, 0  ;;  %p234_p2 = scmp.eq.s32.totalorder %s926_s13, 1 }
   0x7   : > { %p239_p3 = scmp.ne.s32.totalorder %s841_s10, %s837_s30  ;;  %p240_p4 = scmp.eq.s32.totalorder %s678_s14, 1 }
   0x8   : > { %s941_s18 = scalar_select %p221_p1, %s845_s11, %s223_s16  }
   0x9   : > { %p943_p5 = por %p234_p2, %p233_p0  ;;  %p947_p6 = por %p240_p4, %p239_p3 }
   0xa   : > { %p681_p7 = scmp.ge.s32.totalorder %s849_s12, 1  ;;  %p289_p8 = scmp.lt.s32.totalorder %s849_s12, 3 }
   0xc   : > { %p290_p9 = pnand %p681_p7, %p289_p8 }
   0xd   : > { %v331_v0 = vld [vmem:[%s1046_s1] sm:$0x7] (!%p290_p9)  ;;  %vm336_vm0 = vcmask (!%p290_p9), 1042432   ;;  %p324_p10 = scmp.lt.s32.totalorder (!%p290_p9), %s926_s13, 1  ;;  %v851_v1 = vmov (!%p290_p9), 0.0   ;;  %vm852_vm1 = vmmov (!%p290_p9), 0   ;;  %v385_v8 = vlaneseq (!%p290_p9) }
   0xe   : > { %293 = sbr.rel (%p290_p9) target bundleno = 916 (0x394), region = 56  ;;  %709 = vmatprep.subr.bf16.mxu0 (!%p290_p9), %v851_v1  ;;  %v338_v2 = vsel (!%p290_p9), %vm336_vm0, %v331_v0, 0  ;;  %711 = vmatprep.mubr.msk.bf16.mxu0 (!%p290_p9), %vm852_vm1, %v851_v1  ;;  %vm332_vm2 = vcmask (!%p290_p9), 48128   ;;  %v781_v5 = vld [vmem:[%s1048_s3] sm:$0xff] (!%p290_p9)   ;;  %v782_v6 = vld [vmem:[%s1048_s3 + $0x8] sm:$0xff] (!%p290_p9)   ;;  %vm407_vm3 = vcmask (!%p290_p9), 261120  }
   0xf   : > { %710 = vmatpush3.bf16.msra.mxu0 (!%p290_p9), %v338_v2  ;;  %715 = vmatprep.subr.bf16.mxu1 (!%p290_p9), %v851_v1  ;;  %v783_v7 = vld [vmem:[%s1050_s5] sm:$0xff] (!%p290_p9)   ;;  %v386_v9 = vshrl.u32 (!%p290_p9), %v385_v8, 7  ;;  %v853_v20 = vmov (!%p290_p9), 0   ;;  %v784_v22 = vld [vmem:[%s1050_s5 + $0x8] sm:$0xff] (!%p290_p9)   ;;  %s695_s26 = sshll.u32 (!%p290_p9), %s926_s13, 7  ;;  %vm603_vm4 = vcmask (!%p290_p9), 130048  }
  0x10   : > { %719 = vmatprep.mubr.msk.bf16.mxu1 (!%p290_p9), %vm852_vm1, %v851_v1  ;;  %723 = vmatprep.subr.bf16.mxu0 (!%p290_p9), %v851_v1  ;;  %v381_v10 = vld [vmem:[%s1047_s2] sm:$0x1] (!%p290_p9)  ;;  %v786_v34 = vld [vmem:[%s1052_s7 + $0x8] sm:$0xff] (!%p290_p9)   ;;  %s1003_s16 = scalar_lea.hbm (!%p290_p9), %s1054_s9, %s695_s26 }
  0x11   : > { %716 = vmatpush3.bf16.msra.mxu1 (!%p290_p9), %v781_v5  ;;  %v383_v11 = vpack.i.b16 (!%p290_p9), %v381_v10, %v381_v10  ;;  %v387_v12 = vsub.s32 (!%p290_p9), 0, %v386_v9  ;;  %v785_v23 = vld [vmem:[%s1052_s7] sm:$0xff] (!%p290_p9)  }
  0x12   : > { %717 = vmatprep.subr.bf16.mxu1 (!%p290_p9), %v851_v1  ;;  %v452_v24 = vld [vmem:[%s1049_s4] sm:$0x1] (!%p290_p9) }
  0x13   : > { %v388_v13 = vrot.slane (!%p290_p9), %v383_v11, %v387_v12  ;;  %v454_v25 = vpack.i.b16 (!%p290_p9), %v452_v24, %v452_v24  ;;  %v522_v35 = vld [vmem:[%s1051_s6] sm:$0x1] (!%p290_p9) }
  0x14   : > { %v524_v36 = vpack.i.b16 (!%p290_p9), %v522_v35, %v522_v35  ;;  %v592_v45 = vld [vmem:[%s1053_s8] sm:$0x1] (!%p290_p9) }
  0x15   : > { %s325_s23 = scalar_select %p324_p10, %s926_s13, 1  ;;  %718 = vmatpush3.bf16.msra.mxu1 %v782_v6  ;;  %v459_v26 = vrot.slane %v454_v25, %v387_v12  ;;  %v594_v46 = vpack.i.b16 %v592_v45, %v592_v45 }
  0x16   : > { %731 = vmatprep.subr.bf16.mxu1 %v851_v1  ;;  %v529_v37 = vrot.slane %v524_v36, %v387_v12  ;;  %s854_s13 = smov [#allocation2]  }
  0x17   : > { %s683_s24 = sshll.u32 %s325_s23, 3  ;;  %v599_v47 = vrot.slane %v594_v46, %v387_v12  ;;  %s791_s22 = sshll.u32 %s854_s13, 4  ;;  %s792_s22 = int_to_ptr.vmem [resolvable:$false] %s791_s22 }
  0x18   : > { %s327_s27 = scalar_lea.vmem %s1045_s0, %s683_s24  ;;  %s321_s24 = sand.u32 1, %s841_s10  }
  0x19   : > { %v329_v3 = vld [vmem:[%s327_s27] sm:$0xff]  ;;  %s682_s25 = sshll.u32 %s321_s24, 3  ;;  %s606_s17 = scalar_lea.sflag [#allocation3], %s321_s24 }
  0x1a   : > { %v330_v4 = vpack.c.bf16 %v329_v3, %v329_v3  ;;  %s323_s27 = scalar_lea.vmem [#allocation2], %s682_s25  ;;  %s793_s23 = scalar_lea.vmem %s792_s22, 256 }
  0x1b   : > { %s619_s28 = sshll.u32 %s323_s27, 4  ;;  %s1005_s28 = int_to_ptr.vmem [resolvable:$true] %s619_s28 }
  0x1c   : > { %712 = vmatmul.mubr.msk.bf16.vlgmr.msra.gmra.mrb[0].mxu0 %vm332_vm2, %v330_v4  ;;  %s787_s21 = scalar_lea.vmem %s1005_s28, 128  ;;  %p794_p0 = scmp.lt.s32.totalorder %s1005_s28, %s792_s22 }
  0x1d   : > { %727 = vmatprep.mubr.msk.bf16.mxu0 %vm852_vm1, %v851_v1  ;;  %724 = vmatpush3.bf16.msra.mxu0 %v783_v7  ;;  %p788_p11 = scmp.ne.s32.totalorder %s1005_s28, %s787_s21  ;;  %p795_p1 = scmp.lt.s32.totalorder %s793_s23, %s787_s21 }
  0x1e   : > { %725 = vmatprep.subr.bf16.mxu0 %v851_v1 }
  0x1f   : > { %p789_p12 = pnand %p788_p11, %p943_p5  ;;  %p796_p2 = por %p795_p1, %p794_p0 }
  0x21   : > { %726 = vmatpush3.bf16.msra.mxu0 %v784_v22  ;;  %p790_p13 = pneg %p789_p12 }
  0x23   : > { %p797_p3 = pnand %p796_p2, %p790_p13 }
  0xef   : > { %v374_v14 = vpop.f32.mrb[0].mxu0 }
  0xf0   : > { %v380_v15 = vpack.c.bf16 %v374_v14, %v374_v14  ;;  %v713_v16 = vpop.f32.mrb[1].mxu0 }
  0xf1   : > { %v377_v17 = vpop.f32.mrb[2].mxu0 }
  0xf2   : > { %v389_v18 = vadd.bf16 %v388_v13, %v380_v15  ;;  %v714_v19 = vpop.f32.mrb[3].mxu0 }
  0xf4   : > { %v390_v21 = vmax.bf16 %v853_v20, %v389_v18 }
  0xf6   : > { %720 = vmatmul.mubr.msk.bf16.vlgmr.msra.gmra.mrb[0].mxu1 %vm407_vm3, %v390_v21 }
  0xf7   : > { %735 = vmatprep.mubr.msk.bf16.mxu1 %vm852_vm1, %v851_v1  ;;  %732 = vmatpush3.bf16.msra.mxu1 %v785_v23 }
  0xf8   : > { %733 = vmatprep.subr.bf16.mxu1 %v851_v1 }
  0xfb   : > { %734 = vmatpush3.bf16.msra.mxu1 %v786_v34 }
 0x1c9   : > { %v445_v27 = vpop.f32.mrb[0].mxu1 }
 0x1ca   : > { %v451_v28 = vpack.c.bf16 %v445_v27, %v445_v27  ;;  %v721_v29 = vpop.f32.mrb[1].mxu1 }
 0x1cb   : > { %v448_v30 = vpop.f32.mrb[2].mxu1 }
 0x1cc   : > { %v460_v31 = vadd.bf16 %v459_v26, %v451_v28  ;;  %v722_v32 = vpop.f32.mrb[3].mxu1 }
 0x1ce   : > { %v461_v33 = vmax.bf16 %v853_v20, %v460_v31 }
 0x1d0   : > { %728 = vmatmul.mubr.msk.bf16.vlgmr.msra.gmra.mrb[4].mxu0 %vm407_vm3, %v461_v33 }
 0x2a3   : > { %v515_v38 = vpop.f32.mrb[4].mxu0 }
 0x2a4   : > { %v521_v39 = vpack.c.bf16 %v515_v38, %v515_v38  ;;  %v729_v40 = vpop.f32.mrb[5].mxu0 }
 0x2a5   : > { %v518_v41 = vpop.f32.mrb[6].mxu0 }
 0x2a6   : > { %v530_v42 = vadd.bf16 %v529_v37, %v521_v39  ;;  %v730_v43 = vpop.f32.mrb[7].mxu0 }
 0x2a8   : > { %v531_v44 = vmax.bf16 %v853_v20, %v530_v42 }
 0x2aa   : > { %736 = vmatmul.mubr.msk.bf16.vlgmr.msra.gmra.mrb[4].mxu1 %vm407_vm3, %v531_v44 }
 0x37d   : > { %v585_v48 = vpop.f32.mrb[4].mxu1 }
 0x37e   : > { %v591_v49 = vpack.c.bf16 %v585_v48, %v585_v48  ;;  %v737_v50 = vpop.f32.mrb[5].mxu1 }
 0x37f   : > { %v588_v51 = vpop.f32.mrb[6].mxu1 }
 0x380   : > { %v600_v52 = vadd.bf16 %v599_v47, %v591_v49  ;;  %v738_v53 = vpop.f32.mrb[7].mxu1 }
 0x382   : > { %v601_v54 = vmax.bf16 %v853_v20, %v600_v52 }
 0x384   : > { %v602_v55 = vunpack.c.l.bf16 %v601_v54 }
 0x386   : > { %604 = vst.msk [vmem:[%s323_s27] sm:$0xff] %vm603_vm4, %v602_v55 }
 0x387   : > { %800 = shalt.err (!%p797_p3)
}
 0x388   : > { %s801_s24 = scalar_lea.hbm %s1003_s16, 128  ;;  %s805_s27 = scalar_lea.hbm %s1054_s9, 256 }
 0x389   : > { %p802_p4 = scmp.ne.s32.totalorder %s1003_s16, %s801_s24  ;;  %p806_p9 = scmp.lt.u32.totalorder %s1003_s16, %s1054_s9 }
 0x38a   : > { %p807_p10 = scmp.lt.u32.totalorder %s805_s27, %s801_s24  ;;  %p809_p12 = scmp.lt.u32.totalorder %s801_s24, %s1003_s16 }
 0x38b   : > { %p803_p7 = pnand %p802_p4, %p943_p5 }
 0x38c   : > { %p808_p11 = por %p807_p10, %p806_p9 }
 0x38d   : > { %p804_p8 = pneg %p803_p7 }
 0x38e   : > { %p810_p13 = por %p809_p12, %p808_p11 }
 0x390   : > { %p811_p0 = pnand %p810_p13, %p804_p8 }
 0x392   : > { %814 = shalt.err (!%p811_p0)
}
 0x393   : > { %739 = dma.vmem_to_hbm [thread:$0]  (%p943_p5), %s1005_s28, 128, %s1003_s16, %s606_s17  }
 0x394 PF: > { %p745_p1 = scmp.ge.s32.totalorder %s849_s12, 2  ;;  %s631_s21 = sand.u32 1, %s837_s30  }
 0x395   : > { %s632_s13 = scalar_lea.sflag [#allocation3], %s631_s21 }
 0x396   : > { %p742_p2 = pnand %p745_p1, %p947_p6 }
 0x398   : > { %832 = dma.done.wait (!%p742_p2), %s632_s13, 128  }
 0x399   : > { %834 = vsyncadd (!%p742_p2), %s632_s13, 4294967168  ;;  %p19_p3 = scmp.ge.s32.totalorder %s930_s15, 4   ;;  %s1057_s30 = smov %s841_s10 }
 0x39a   : > { %s1058_s10 = smov %s845_s11  ;;  %s1059_s11 = smov %s941_s18 }
 0x39b   : > { %s1060_s12 = smov %s930_s15  ;;  %21 = sbr.rel (!%p19_p3) target bundleno = 3 (0x3), region = 91 }
 0x3a2   :  { %637 = vsyncpa [#allocation3], 1 }
 0x3a3   :  { %639 = vsyncpa [#allocation3 + $0x1], 1 }

// kernel: tpu_custom_call.1
= control target key start
LH: loop header
LB: loop body
LE: loop exit
PB: predicated region body
PF: predicated region fallthrough
CT: control target
= control target key end

     0   :  { %14 = vsyncpa [#allocation3], 0  ;;  %s1045_s0 = inlined_call_operand.vmem [shape: f32[16,6], index: 0, kind: input, shape index: {}]   ;;  %s1046_s1 = inlined_call_operand.vmem [shape: bf16[6,32], index: 1, kind: input, shape index: {}]   ;;  %s1047_s2 = inlined_call_operand.vmem [shape: bf16[1,32], index: 2, kind: input, shape index: {}]   ;;  %s1048_s3 = inlined_call_operand.vmem [shape: bf16[32,32], index: 3, kind: input, shape index: {}]   ;;  %s1049_s4 = inlined_call_operand.vmem [shape: bf16[1,32], index: 4, kind: input, shape index: {}]   ;;  %s1050_s5 = inlined_call_operand.vmem [shape: bf16[32,32], index: 5, kind: input, shape index: {}]   ;;  %s1051_s6 = inlined_call_operand.vmem [shape: bf16[1,32], index: 6, kind: input, shape index: {}]   ;;  %s1052_s7 = inlined_call_operand.vmem [shape: bf16[32,16], index: 7, kind: input, shape index: {}]   ;;  %s1053_s8 = inlined_call_operand.vmem [shape: bf16[1,16], index: 8, kind: input, shape index: {}]   ;;  %s1054_s9 = inlined_call_operand.hbm [shape: f32[16,16], index: 9, kind: output, shape index: {}]  }
   0x1   :  { %16 = vsyncpa [#allocation3 + $0x1], 0  ;;  %s905_s30 = smov 0   ;;  %s907_s10 = smov 0  }
   0x2   :  { %s909_s11 = smov 0   ;;  %s911_s12 = smov 0  }
   0x3 LB: > { %s926_s13 = sadd.s32 4294967295, %s849_s12   ;;  %s678_s14 = sadd.s32 4294967294, %s849_s12   ;;  %s849_s12 = sphi %s911_s12, %s1060_s12   ;;  %s845_s11 = sphi %s909_s11, %s1059_s11   ;;  %s841_s10 = sphi %s907_s10, %s1058_s10   ;;  %s837_s30 = sphi %s905_s30, %s1057_s30  }
   0x4   : > { %s930_s15 = sadd.s32 1, %s849_s12   ;;  %s223_s16 = sadd.s32 1, %s845_s11 }
   0x5   : > { %s220_s17 = ssub.s32 %s849_s12, %s930_s15  ;;  %p233_p0 = scmp.ne.s32.totalorder %s845_s11, %s841_s10 }
   0x6   : > { %p221_p1 = scmp.eq.s32.totalorder %s220_s17, 0  ;;  %p234_p2 = scmp.eq.s32.totalorder %s926_s13, 1 }
   0x7   : > { %p239_p3 = scmp.ne.s32.totalorder %s841_s10, %s837_s30  ;;  %p240_p4 = scmp.eq.s32.totalorder %s678_s14, 1 }
   0x8   : > { %s941_s18 = scalar_select %p221_p1, %s845_s11, %s223_s16  }
   0x9   : > { %p943_p5 = por %p234_p2, %p233_p0  ;;  %p947_p6 = por %p240_p4, %p239_p3 }
   0xa   : > { %p681_p7 = scmp.ge.s32.totalorder %s849_s12, 1  ;;  %p289_p8 = scmp.lt.s32.totalorder %s849_s12, 3 }
   0xc   : > { %p290_p9 = pnand %p681_p7, %p289_p8 }
   0xd   : > { %v331_v0 = vld [vmem:[%s1046_s1] sm:$0x7] (!%p290_p9)  ;;  %vm336_vm0 = vcmask (!%p290_p9), 1042432   ;;  %p324_p10 = scmp.lt.s32.totalorder (!%p290_p9), %s926_s13, 1  ;;  %v851_v1 = vmov (!%p290_p9), 0.0   ;;  %vm852_vm1 = vmmov (!%p290_p9), 0   ;;  %v385_v8 = vlaneseq (!%p290_p9) }
   0xe   : > { %293 = sbr.rel (%p290_p9) target bundleno = 916 (0x394), region = 56  ;;  %709 = vmatprep.subr.bf16.mxu0 (!%p290_p9), %v851_v1  ;;  %v338_v2 = vsel (!%p290_p9), %vm336_vm0, %v331_v0, 0  ;;  %711 = vmatprep.mubr.msk.bf16.mxu0 (!%p290_p9), %vm852_vm1, %v851_v1  ;;  %vm332_vm2 = vcmask (!%p290_p9), 48128   ;;  %v781_v5 = vld [vmem:[%s1048_s3] sm:$0xff] (!%p290_p9)   ;;  %v782_v6 = vld [vmem:[%s1048_s3 + $0x8] sm:$0xff] (!%p290_p9)   ;;  %vm407_vm3 = vcmask (!%p290_p9), 261120  }
   0xf   : > { %710 = vmatpush3.bf16.msra.mxu0 (!%p290_p9), %v338_v2  ;;  %715 = vmatprep.subr.bf16.mxu1 (!%p290_p9), %v851_v1  ;;  %v783_v7 = vld [vmem:[%s1050_s5] sm:$0xff] (!%p290_p9)   ;;  %v386_v9 = vshrl.u32 (!%p290_p9), %v385_v8, 7  ;;  %v853_v20 = vmov (!%p290_p9), 0   ;;  %v784_v22 = vld [vmem:[%s1050_s5 + $0x8] sm:$0xff] (!%p290_p9)   ;;  %s695_s26 = sshll.u32 (!%p290_p9), %s926_s13, 7  ;;  %vm603_vm4 = vcmask (!%p290_p9), 130048  }
  0x10   : > { %719 = vmatprep.mubr.msk.bf16.mxu1 (!%p290_p9), %vm852_vm1, %v851_v1  ;;  %723 = vmatprep.subr.bf16.mxu0 (!%p290_p9), %v851_v1  ;;  %v381_v10 = vld [vmem:[%s1047_s2] sm:$0x1] (!%p290_p9)  ;;  %v786_v34 = vld [vmem:[%s1052_s7 + $0x8] sm:$0xff] (!%p290_p9)   ;;  %s1003_s16 = scalar_lea.hbm (!%p290_p9), %s1054_s9, %s695_s26 }
  0x11   : > { %716 = vmatpush3.bf16.msra.mxu1 (!%p290_p9), %v781_v5  ;;  %v383_v11 = vpack.i.b16 (!%p290_p9), %v381_v10, %v381_v10  ;;  %v387_v12 = vsub.s32 (!%p290_p9), 0, %v386_v9  ;;  %v785_v23 = vld [vmem:[%s1052_s7] sm:$0xff] (!%p290_p9)  }
  0x12   : > { %717 = vmatprep.subr.bf16.mxu1 (!%p290_p9), %v851_v1  ;;  %v452_v24 = vld [vmem:[%s1049_s4] sm:$0x1] (!%p290_p9) }
  0x13   : > { %v388_v13 = vrot.slane (!%p290_p9), %v383_v11, %v387_v12  ;;  %v454_v25 = vpack.i.b16 (!%p290_p9), %v452_v24, %v452_v24  ;;  %v522_v35 = vld [vmem:[%s1051_s6] sm:$0x1] (!%p290_p9) }
  0x14   : > { %v524_v36 = vpack.i.b16 (!%p290_p9), %v522_v35, %v522_v35  ;;  %v592_v45 = vld [vmem:[%s1053_s8] sm:$0x1] (!%p290_p9) }
  0x15   : > { %s325_s23 = scalar_select %p324_p10, %s926_s13, 1  ;;  %718 = vmatpush3.bf16.msra.mxu1 %v782_v6  ;;  %v459_v26 = vrot.slane %v454_v25, %v387_v12  ;;  %v594_v46 = vpack.i.b16 %v592_v45, %v592_v45 }
  0x16   : > { %731 = vmatprep.subr.bf16.mxu1 %v851_v1  ;;  %v529_v37 = vrot.slane %v524_v36, %v387_v12  ;;  %s854_s13 = smov [#allocation2]  }
  0x17   : > { %s683_s24 = sshll.u32 %s325_s23, 3  ;;  %v599_v47 = vrot.slane %v594_v46, %v387_v12  ;;  %s791_s22 = sshll.u32 %s854_s13, 4  ;;  %s792_s22 = int_to_ptr.vmem [resolvable:$false] %s791_s22 }
  0x18   : > { %s327_s27 = scalar_lea.vmem %s1045_s0, %s683_s24  ;;  %s321_s24 = sand.u32 1, %s841_s10  }
  0x19   : > { %v329_v3 = vld [vmem:[%s327_s27] sm:$0xff]  ;;  %s682_s25 = sshll.u32 %s321_s24, 3  ;;  %s606_s17 = scalar_lea.sflag [#allocation3], %s321_s24 }
  0x1a   : > { %v330_v4 = vpack.c.bf16 %v329_v3, %v329_v3  ;;  %s323_s27 = scalar_lea.vmem [#allocation2], %s682_s25  ;;  %s793_s23 = scalar_lea.vmem %s792_s22, 256 }
  0x1b   : > { %s619_s28 = sshll.u32 %s323_s27, 4  ;;  %s1005_s28 = int_to_ptr.vmem [resolvable:$true] %s619_s28 }
  0x1c   : > { %712 = vmatmul.mubr.msk.bf16.vlgmr.msra.gmra.mrb[0].mxu0 %vm332_vm2, %v330_v4  ;;  %s787_s21 = scalar_lea.vmem %s1005_s28, 128  ;;  %p794_p0 = scmp.lt.s32.totalorder %s1005_s28, %s792_s22 }
  0x1d   : > { %727 = vmatprep.mubr.msk.bf16.mxu0 %vm852_vm1, %v851_v1  ;;  %724 = vmatpush3.bf16.msra.mxu0 %v783_v7  ;;  %p788_p11 = scmp.ne.s32.totalorder %s1005_s28, %s787_s21  ;;  %p795_p1 = scmp.lt.s32.totalorder %s793_s23, %s787_s21 }
  0x1e   : > { %725 = vmatprep.subr.bf16.mxu0 %v851_v1 }
  0x1f   : > { %p789_p12 = pnand %p788_p11, %p943_p5  ;;  %p796_p2 = por %p795_p1, %p794_p0 }
  0x21   : > { %726 = vmatpush3.bf16.msra.mxu0 %v784_v22  ;;  %p790_p13 = pneg %p789_p12 }
  0x23   : > { %p797_p3 = pnand %p796_p2, %p790_p13 }
  0xef   : > { %v374_v14 = vpop.f32.mrb[0].mxu0 }
  0xf0   : > { %v380_v15 = vpack.c.bf16 %v374_v14, %v374_v14  ;;  %v713_v16 = vpop.f32.mrb[1].mxu0 }
  0xf1   : > { %v377_v17 = vpop.f32.mrb[2].mxu0 }
  0xf2   : > { %v389_v18 = vadd.bf16 %v388_v13, %v380_v15  ;;  %v714_v19 = vpop.f32.mrb[3].mxu0 }
  0xf4   : > { %v390_v21 = vmax.bf16 %v853_v20, %v389_v18 }
  0xf6   : > { %720 = vmatmul.mubr.msk.bf16.vlgmr.msra.gmra.mrb[0].mxu1 %vm407_vm3, %v390_v21 }
  0xf7   : > { %735 = vmatprep.mubr.msk.bf16.mxu1 %vm852_vm1, %v851_v1  ;;  %732 = vmatpush3.bf16.msra.mxu1 %v785_v23 }
  0xf8   : > { %733 = vmatprep.subr.bf16.mxu1 %v851_v1 }
  0xfb   : > { %734 = vmatpush3.bf16.msra.mxu1 %v786_v34 }
 0x1c9   : > { %v445_v27 = vpop.f32.mrb[0].mxu1 }
 0x1ca   : > { %v451_v28 = vpack.c.bf16 %v445_v27, %v445_v27  ;;  %v721_v29 = vpop.f32.mrb[1].mxu1 }
 0x1cb   : > { %v448_v30 = vpop.f32.mrb[2].mxu1 }
 0x1cc   : > { %v460_v31 = vadd.bf16 %v459_v26, %v451_v28  ;;  %v722_v32 = vpop.f32.mrb[3].mxu1 }
 0x1ce   : > { %v461_v33 = vmax.bf16 %v853_v20, %v460_v31 }
 0x1d0   : > { %728 = vmatmul.mubr.msk.bf16.vlgmr.msra.gmra.mrb[4].mxu0 %vm407_vm3, %v461_v33 }
 0x2a3   : > { %v515_v38 = vpop.f32.mrb[4].mxu0 }
 0x2a4   : > { %v521_v39 = vpack.c.bf16 %v515_v38, %v515_v38  ;;  %v729_v40 = vpop.f32.mrb[5].mxu0 }
 0x2a5   : > { %v518_v41 = vpop.f32.mrb[6].mxu0 }
 0x2a6   : > { %v530_v42 = vadd.bf16 %v529_v37, %v521_v39  ;;  %v730_v43 = vpop.f32.mrb[7].mxu0 }
 0x2a8   : > { %v531_v44 = vmax.bf16 %v853_v20, %v530_v42 }
 0x2aa   : > { %736 = vmatmul.mubr.msk.bf16.vlgmr.msra.gmra.mrb[4].mxu1 %vm407_vm3, %v531_v44 }
 0x37d   : > { %v585_v48 = vpop.f32.mrb[4].mxu1 }
 0x37e   : > { %v591_v49 = vpack.c.bf16 %v585_v48, %v585_v48  ;;  %v737_v50 = vpop.f32.mrb[5].mxu1 }
 0x37f   : > { %v588_v51 = vpop.f32.mrb[6].mxu1 }
 0x380   : > { %v600_v52 = vadd.bf16 %v599_v47, %v591_v49  ;;  %v738_v53 = vpop.f32.mrb[7].mxu1 }
 0x382   : > { %v601_v54 = vmax.bf16 %v853_v20, %v600_v52 }
 0x384   : > { %v602_v55 = vunpack.c.l.bf16 %v601_v54 }
 0x386   : > { %604 = vst.msk [vmem:[%s323_s27] sm:$0xff] %vm603_vm4, %v602_v55 }
 0x387   : > { %800 = shalt.err (!%p797_p3)
}
 0x388   : > { %s801_s24 = scalar_lea.hbm %s1003_s16, 128  ;;  %s805_s27 = scalar_lea.hbm %s1054_s9, 256 }
 0x389   : > { %p802_p4 = scmp.ne.s32.totalorder %s1003_s16, %s801_s24  ;;  %p806_p9 = scmp.lt.u32.totalorder %s1003_s16, %s1054_s9 }
 0x38a   : > { %p807_p10 = scmp.lt.u32.totalorder %s805_s27, %s801_s24  ;;  %p809_p12 = scmp.lt.u32.totalorder %s801_s24, %s1003_s16 }
 0x38b   : > { %p803_p7 = pnand %p802_p4, %p943_p5 }
 0x38c   : > { %p808_p11 = por %p807_p10, %p806_p9 }
 0x38d   : > { %p804_p8 = pneg %p803_p7 }
 0x38e   : > { %p810_p13 = por %p809_p12, %p808_p11 }
 0x390   : > { %p811_p0 = pnand %p810_p13, %p804_p8 }
 0x392   : > { %814 = shalt.err (!%p811_p0)
}
 0x393   : > { %739 = dma.vmem_to_hbm [thread:$0]  (%p943_p5), %s1005_s28, 128, %s1003_s16, %s606_s17  }
 0x394 PF: > { %p745_p1 = scmp.ge.s32.totalorder %s849_s12, 2  ;;  %s631_s21 = sand.u32 1, %s837_s30  }
 0x395   : > { %s632_s13 = scalar_lea.sflag [#allocation3], %s631_s21 }
 0x396   : > { %p742_p2 = pnand %p745_p1, %p947_p6 }
 0x398   : > { %832 = dma.done.wait (!%p742_p2), %s632_s13, 128  }
 0x399   : > { %834 = vsyncadd (!%p742_p2), %s632_s13, 4294967168  ;;  %p19_p3 = scmp.ge.s32.totalorder %s930_s15, 4   ;;  %s1057_s30 = smov %s841_s10 }
 0x39a   : > { %s1058_s10 = smov %s845_s11  ;;  %s1059_s11 = smov %s941_s18 }
 0x39b   : > { %s1060_s12 = smov %s930_s15  ;;  %21 = sbr.rel (!%p19_p3) target bundleno = 3 (0x3), region = 91 }
 0x3a2   :  { %637 = vsyncpa [#allocation3], 1 }
 0x3a3   :  { %639 = vsyncpa [#allocation3 + $0x1], 1 }

</bundles_post_ra>
